<compile_context>
chip_gen: v7x
topology: tpu7x:2x2x1
jax: 0.10.0
libtpu: 0.0.40
codegen_flags: <defaults>
</compile_context>

<pallas_src>
import functools

import jax
import jax.numpy as jnp
from jax import lax
from jax.experimental import pallas as pl
from jax.experimental.pallas import tpu as pltpu


def _round_up(x: int, m: int) -> int:
    return ((x + m - 1) // m) * m


def _loss_kernel(logits_ref, side_ref, out_ref, *, n_rows: int):
    pid = pl.program_id(0)

    logits = logits_ref[...].astype(jnp.float32)   # (tile, C)
    side = side_ref[...]                           # (tile, 2) f32
    idx = side[:, 0:1].astype(jnp.int32)           # (tile, 1) label index
    maskf = side[:, 1:2]                           # (tile, 1) mask

    tile, c = logits.shape

    # Gate the (possibly out-of-bounds) tail rows of the last tile.  Their
    # VMEM contents are unspecified, so both loss and mask are selected to 0
    # (0 * garbage could be inf * 0 = NaN).
    row = pid * tile + lax.broadcasted_iota(jnp.int32, (tile, 1), 0)
    valid = row < n_rows

    # Stable per-row cross entropy: logsumexp(logits) - logits[label].
    cls_iota = lax.broadcasted_iota(jnp.int32, (tile, c), 1)
    row_max = jnp.max(logits, axis=1, keepdims=True)                 # (tile, 1)
    lse = row_max + jnp.log(
        jnp.sum(jnp.exp(logits - row_max), axis=1, keepdims=True))   # (tile, 1)
    picked = jnp.sum(jnp.where(cls_iota == idx, logits, 0.0),
                     axis=1, keepdims=True)                          # (tile, 1)

    loss = jnp.where(valid, lse - picked, 0.0)                       # (tile, 1)
    maskf = jnp.where(valid, maskf, 0.0)                             # (tile, 1)

    # Per-tile partials: col 0 = sum(loss * mask), col 1 = sum(mask).
    # Single cross-sublane reduction over a (tile, 2) slab.
    lane = lax.broadcasted_iota(jnp.int32, (tile, 2), 1)
    both = jnp.where(lane == 0, loss * maskf, maskf)                 # (tile, 2)
    out_ref[...] = jnp.sum(both, axis=0, keepdims=True).reshape(1, 1, 2)


def _choose_tile(n: int, c: int, itemsize: int, budget_bytes: int = 6 << 20) -> int:
    """Rows per tile so the double-buffered logits tile fits a VMEM budget
    that is safe on every generation (v5e 16 MiB scoped default, v7x 64 MiB
    physical), while keeping tiles large enough to amortize ~0.35us/step."""
    t = budget_bytes // (2 * max(c, 1) * itemsize)
    t = max(8, (t // 8) * 8)           # multiple of 8 sublanes
    t = min(t, 2048)                   # HBM roofline reached well before this
    t = min(t, _round_up(n, 8))        # never bigger than (8-padded) N
    return max(t, 8)


def masked_ce_loss(output, labels, mask, tile_n: int | None = None):
    """output: (N, C) logits (f32/bf16); labels: (N, C) one-hot / soft;
    mask: (N,) float or bool.  Returns the scalar masked-mean cross entropy."""
    n, c = output.shape
    itemsize = jnp.dtype(output.dtype).itemsize

    if tile_n is None:
        tile = _choose_tile(n, c, itemsize)
    else:
        tile = max(8, (min(tile_n, _round_up(n, 8)) // 8) * 8)

    num_tiles = pl.cdiv(n, tile)

    # Pack label index + mask into one (N, 2) f32 side array (class index is
    # exactly representable in f32).  argmax of the one-hot fuses in XLA.
    idx = jnp.argmax(labels, axis=1).astype(jnp.float32)
    side = jnp.stack([idx, mask.astype(jnp.float32)], axis=1)        # (N, 2)

    # VMEM: logits double buffer + lane-padded (tile,128) side double buffer
    # + headroom; clamp to a range safe on v5e/v6e/v7x.
    need = 2 * tile * c * itemsize + 2 * tile * 128 * 4 + (2 << 20)
    vmem_limit = int(min(max(need, 16 << 20), 48 << 20))

    kernel = functools.partial(_loss_kernel, n_rows=n)

    partials = pl.pallas_call(
        kernel,
        out_shape=jax.ShapeDtypeStruct((num_tiles, 1, 2), jnp.float32),
        grid_spec=pltpu.PrefetchScalarGridSpec(
            num_scalar_prefetch=0,
            grid=(num_tiles,),
            in_specs=[
                pl.BlockSpec((tile, c), lambda i: (i, 0)),   # logits (no pad copy)
                pl.BlockSpec((tile, 2), lambda i: (i, 0)),   # [label_idx, mask]
            ],
            out_specs=pl.BlockSpec((1, 1, 2), lambda i: (i, 0, 0)),
        ),
        compiler_params=pltpu.CompilerParams(
            dimension_semantics=("parallel",),   # megacore split on v7x
            vmem_limit_bytes=vmem_limit),
    )(output, side)

    totals = jnp.sum(partials, axis=(0, 1))      # (2,): [sum(l*m), sum(m)]
    # sum(loss*mask) / sum(mask) == mean(loss * mask / mean(mask)).
    # (All-zero mask -> 0/0 = NaN, matching the PyTorch reference.)
    return totals[0] / totals[1]


def _reference(output, labels, mask):
    # Pure-JAX reference mirroring the PyTorch module.
    idx = jnp.argmax(labels, axis=1)
    lse = jax.scipy.special.logsumexp(output.astype(jnp.float32), axis=1)
    picked = jnp.take_along_axis(output.astype(jnp.float32),
                                 idx[:, None], axis=1)[:, 0]
    loss = lse - picked
    m = mask.astype(jnp.float32)
    m = m / jnp.mean(m)
    return jnp.mean(loss * m)


if __name__ == "__main__":
    key = jax.random.PRNGKey(0)
    k1, k2, k3 = jax.random.split(key, 3)

    N, C = 16, 8
    output = jax.random.normal(k1, (N, C), dtype=jnp.float32)
    label_idx = jax.random.randint(k2, (N,), 0, C)
    labels = jax.nn.one_hot(label_idx, C, dtype=jnp.float32)
    mask = (jax.random.uniform(k3, (N,)) > 0.3).astype(jnp.float32)
    # Guarantee a non-degenerate mask (mean > 0).
    mask = mask.at[0].set(1.0)

    result = masked_ce_loss(output, labels, mask)
    jax.block_until_ready(result)

    ref = _reference(output, labels, mask)
    assert jnp.allclose(result, ref, rtol=1e-5, atol=1e-5), (result, ref)

    # Non-aligned N with a forced small tile: exercises the multi-tile grid
    # and the in-kernel out-of-bounds row gating of the tail tile (no pad).
    N2 = 1000
    kk1, kk2, kk3 = jax.random.split(jax.random.PRNGKey(1), 3)
    out2 = jax.random.normal(kk1, (N2, C), dtype=jnp.float32)
    lab2 = jax.nn.one_hot(jax.random.randint(kk2, (N2,), 0, C), C,
                          dtype=jnp.float32)
    mask2 = (jax.random.uniform(kk3, (N2,)) > 0.3).astype(jnp.float32)
    mask2 = mask2.at[0].set(1.0)
    res2 = masked_ce_loss(out2, lab2, mask2, tile_n=256)
    jax.block_until_ready(res2)
    ref2 = _reference(out2, lab2, mask2)
    assert jnp.allclose(res2, ref2, rtol=1e-5, atol=1e-5), (res2, ref2)

    print("KERNEL_OK")
</pallas_src>

<mosaic_0001>
module attributes {stable_mosaic.version = 11 : i64} {
  func.func @_loss_kernel(%arg0: i32, %arg1: memref<16x8xf32, #tpu.memory_space<vmem>>, %arg2: memref<16x2xf32, #tpu.memory_space<vmem>>, %arg3: memref<1x1x2xf32, #tpu.memory_space<vmem>>) attributes {dimension_semantics = [#tpu.dimension_semantics<parallel>], iteration_bounds = array<i64: 1>, scalar_prefetch = 0 : i64, scratch_operands = 0 : i64, tpu.core_type = #tpu.core_type<tc>, window_params = [{transform_indices = @transform_0, window_bounds = array<i64: 16, 8>}, {transform_indices = @transform_1, window_bounds = array<i64: 16, 2>}, {transform_indices = @transform_2, window_bounds = array<i64: 1, 1, 2>}]} {
    %c0 = arith.constant 0 : index
    %c0_0 = arith.constant 0 : index
    %0 = vector.load %arg1[%c0, %c0_0] : memref<16x8xf32, #tpu.memory_space<vmem>>, vector<16x8xf32>
    %c0_1 = arith.constant 0 : index
    %c0_2 = arith.constant 0 : index
    %1 = vector.load %arg2[%c0_1, %c0_2] : memref<16x2xf32, #tpu.memory_space<vmem>>, vector<16x2xf32>
    %2 = vector.extract_strided_slice %1 {offsets = [0, 0], sizes = [16, 1], strides = [1, 1]} : vector<16x2xf32> to vector<16x1xf32>
    %3 = arith.fptosi %2 : vector<16x1xf32> to vector<16x1xi32>
    %4 = vector.extract_strided_slice %1 {offsets = [0, 1], sizes = [16, 1], strides = [1, 1]} : vector<16x2xf32> to vector<16x1xf32>
    %c16_i32 = arith.constant 16 : i32
    %5 = arith.muli %arg0, %c16_i32 : i32
    %6 = tpu.iota {dimensions = array<i32: 0>} : vector<16x1xi32>
    %7 = vector.broadcast %5 : i32 to vector<16x1xi32>
    %8 = arith.addi %7, %6 : vector<16x1xi32>
    %c16_i32_3 = arith.constant 16 : i32
    %9 = vector.broadcast %c16_i32_3 : i32 to vector<16x1xi32>
    %10 = arith.cmpi slt, %8, %9 : vector<16x1xi32>
    %11 = tpu.iota {dimensions = array<i32: 1>} : vector<16x8xi32>
    %cst = arith.constant dense<0xFF800000> : vector<16xf32>
    %12 = vector.multi_reduction <maximumf>, %0, %cst [1] : vector<16x8xf32> to vector<16xf32>
    %13 = vector.shape_cast %12 : vector<16xf32> to vector<16x1xf32>
    %14 = vector.broadcast %13 : vector<16x1xf32> to vector<16x8xf32>
    %15 = arith.subf %0, %14 : vector<16x8xf32>
    %16 = math.exp %15 : vector<16x8xf32>
    %cst_4 = arith.constant dense<0.000000e+00> : vector<16xf32>
    %17 = vector.multi_reduction <add>, %16, %cst_4 [1] : vector<16x8xf32> to vector<16xf32>
    %18 = vector.shape_cast %17 : vector<16xf32> to vector<16x1xf32>
    %19 = math.log %18 : vector<16x1xf32>
    %20 = arith.addf %13, %19 : vector<16x1xf32>
    %21 = vector.broadcast %3 : vector<16x1xi32> to vector<16x8xi32>
    %22 = arith.cmpi eq, %11, %21 : vector<16x8xi32>
    %cst_5 = arith.constant 0.000000e+00 : f32
    %23 = vector.broadcast %cst_5 : f32 to vector<16x8xf32>
    %24 = arith.select %22, %0, %23 : vector<16x8xi1>, vector<16x8xf32>
    %cst_6 = arith.constant dense<0.000000e+00> : vector<16xf32>
    %25 = vector.multi_reduction <add>, %24, %cst_6 [1] : vector<16x8xf32> to vector<16xf32>
    %26 = vector.shape_cast %25 : vector<16xf32> to vector<16x1xf32>
    %27 = arith.subf %20, %26 : vector<16x1xf32>
    %cst_7 = arith.constant 0.000000e+00 : f32
    %28 = vector.broadcast %cst_7 : f32 to vector<16x1xf32>
    %29 = arith.select %10, %27, %28 : vector<16x1xi1>, vector<16x1xf32>
    %cst_8 = arith.constant 0.000000e+00 : f32
    %30 = vector.broadcast %cst_8 : f32 to vector<16x1xf32>
    %31 = arith.select %10, %4, %30 : vector<16x1xi1>, vector<16x1xf32>
    %32 = tpu.iota {dimensions = array<i32: 1>} : vector<16x2xi32>
    %c0_i32 = arith.constant 0 : i32
    %33 = vector.broadcast %c0_i32 : i32 to vector<16x2xi32>
    %34 = arith.cmpi eq, %32, %33 : vector<16x2xi32>
    %35 = arith.mulf %29, %31 : vector<16x1xf32>
    %36 = vector.shape_cast %35 : vector<16x1xf32> to vector<16x1xf32>
    %37 = vector.broadcast %36 : vector<16x1xf32> to vector<16x2xf32>
    %38 = vector.shape_cast %31 : vector<16x1xf32> to vector<16x1xf32>
    %39 = vector.broadcast %38 : vector<16x1xf32> to vector<16x2xf32>
    %40 = arith.select %34, %37, %39 : vector<16x2xi1>, vector<16x2xf32>
    %cst_9 = arith.constant dense<0.000000e+00> : vector<2xf32>
    %41 = vector.multi_reduction <add>, %40, %cst_9 [0] : vector<16x2xf32> to vector<2xf32>
    %42 = vector.shape_cast %41 : vector<2xf32> to vector<1x2xf32>
    %43 = vector.shape_cast %42 : vector<1x2xf32> to vector<1x1x2xf32>
    %c0_10 = arith.constant 0 : index
    %c0_11 = arith.constant 0 : index
    %c0_12 = arith.constant 0 : index
    %44 = vector.load %arg3[%c0_10, %c0_11, %c0_12] : memref<1x1x2xf32, #tpu.memory_space<vmem>>, vector<1x1x2xf32>
    tpu.vector_store %arg3[%c0_10, %c0_11, %c0_12], %43 {strides = array<i32>} : memref<1x1x2xf32, #tpu.memory_space<vmem>>, vector<1x1x2xf32>,
    return
  }
  func.func @transform_0(%arg0: i32) -> (i32, i32) {
    %c0_i32 = arith.constant 0 : i32
    %c0_i32_0 = arith.constant 0 : i32
    return %arg0, %c0_i32 : i32, i32
  }
  func.func @transform_1(%arg0: i32) -> (i32, i32) {
    %c0_i32 = arith.constant 0 : i32
    %c0_i32_0 = arith.constant 0 : i32
    return %arg0, %c0_i32 : i32, i32
  }
  func.func @transform_2(%arg0: i32) -> (i32, i32, i32) {
    %c0_i32 = arith.constant 0 : i32
    %c0_i32_0 = arith.constant 0 : i32
    %c0_i32_1 = arith.constant 0 : i32
    return %arg0, %c0_i32, %c0_i32_0 : i32, i32, i32
  }
}

</mosaic_0001>

<bundles_post_ra>
// kernel: tpu_custom_call.1
= control target key start
LH: loop header
LB: loop body
LE: loop exit
PB: predicated region body
PF: predicated region fallthrough
CT: control target
= control target key end

     0   :  { %vm29_vm0 = vcmask 64512   ;;  %v169_v4 = vmov 0   ;;  %s217_s0 = inlined_call_operand.vmem [shape: f32[16,8], index: 0, kind: input, shape index: {}]   ;;  %s218_s1 = inlined_call_operand.vmem [shape: f32[16,2], index: 1, kind: input, shape index: {}]   ;;  %s219_s2 = inlined_call_operand.hbm [shape: f32[1,1,2], index: 2, kind: output, shape index: {}]  }
   0x1   :  { %v12_v0 = vld [vmem:[%s217_s0] sm:$0xff]  ;;  %v13_v1 = vld [vmem:[%s217_s0 + $0x8] sm:$0xff]  ;;  %134 = vset.pattern.permute.xlu1 %v169_v4 }
   0x2   :  { %v14_v2 = vld [vmem:[%s218_s1] sm:$0xff]  ;;  %v30_v3 = vsel %vm29_vm0, %v12_v0, -inf  ;;  %v15_v6 = vld [vmem:[%s218_s1 + $0x8] sm:$0xff] }
   0x3   :  { %v127_v5 = vtrunc.f32 %v14_v2 }
   0x4   :  { %7 = vsyncpa [#allocation3], 0  ;;  %31 = vmax.xlane.f32.xlu0 %v30_v3  ;;  %v129_v7 = vtrunc.f32 %v15_v6  ;;  %v33_v8 = vsel %vm29_vm0, %v13_v1, -inf  ;;  %v27_v15 = vlaneseq  ;;  %v170_v29 = vmov 1   ;;  %s171_s0 = smov [#allocation2]  }
   0x5   :  { %v128_v9 = vcvt.f32.s32 %v127_v5  ;;  %135 = vset.pattern.permute.xlu0 %v170_v29  ;;  %vm101_vm4 = vcmask 15360   ;;  %s119_s1 = sshll.u32 %s171_s0, 4  ;;  %vm111_vm5 = vcmask 8192   ;;  %s120_s1 = int_to_ptr.vmem [resolvable:$true] %s119_s1 }
   0x6   :  { %v130_v10 = vcvt.f32.s32 %v129_v7  ;;  %v28_v19 = vand.u32 127, %v27_v15  ;;  %s145_s17 = scalar_lea.vmem %s120_s1, 16  ;;  %s149_s18 = scalar_lea.vmem %s120_s1, 32 }
   0x7   :  { %55 = vperm.xlu1 %134, %v128_v9   ;;  %p146_p0 = scmp.ne.s32.totalorder %s120_s1, %s145_s17  ;;  %p150_p1 = scmp.lt.s32.totalorder %s120_s1, %s120_s1 }
   0x8   :  { %34 = vmax.xlane.f32.xlu0 %v33_v8  ;;  %vm76_vm3 = vcmp.eq.s32.totalorder %v28_v19, 0  ;;  %p151_p2 = scmp.lt.s32.totalorder %s149_s18, %s145_s17 }
   0xa   :  { %p152_p3 = por %p151_p2, %p150_p1 }
   0xb   :  { %58 = vperm.xlu1 %134, %v130_v10  }
   0xc   :  { %p153_p4 = pnand %p152_p3, %p146_p0 }
   0xf   :  { %136 = vset.pattern.permute.xlu1 %v170_v29 }
  0x86   :  { %v56_v18 = vpop.permute.xlu1 %55 }
  0x87   :  { %vm60_vm1 = vcmp.eq.s32.totalorder %v28_v19, %v56_v18 }
  0x88   :  { %v62_v22 = vsel %vm60_vm1, %v12_v0, 0.0 }
  0x89   :  { %v64_v24 = vsel %vm29_vm0, %v62_v22, 0.0 }
  0x8a   :  { %v59_v20 = vpop.permute.xlu1 %58 }
  0x8b   :  { %vm61_vm2 = vcmp.eq.s32.totalorder %v28_v19, %v59_v20 }
  0x8c   :  { %v63_v26 = vsel %vm61_vm2, %v13_v1, 0.0 }
  0x8d   :  { %v67_v28 = vsel %vm29_vm0, %v63_v26, 0.0 }
  0x91   :  { %v32_v11 = vpop.xlane.xlu0 %31 }
  0x92   :  { %v36_v12 = vsub.f32 %v12_v0, %v32_v11 }
  0x94   :  { %v38_v13 = vmul.f32 1.442695, %v36_v12 }
  0x95   :  { %v35_v14 = vpop.xlane.xlu0 %34 }
  0x96   :  { %137 = vpow2.f32 %v38_v13  ;;  %v37_v16 = vsub.f32 %v13_v1, %v35_v14 }
  0x98   :  { %v40_v17 = vmul.f32 1.442695, %v37_v16 }
  0x9a   :  { %139 = vpow2.f32 %v40_v17 }
  0xa0   :  { %v138_v21 = vpop.eup %137 }
  0xa1   :  { %v42_v23 = vsel %vm29_vm0, %v138_v21, 0.0 }
  0xa2   :  { %43 = vadd.xlane.f32.xlu0 %v42_v23 }
  0xa4   :  { %v140_v25 = vpop.eup %139 }
  0xa5   :  { %v45_v27 = vsel %vm29_vm0, %v140_v25, 0.0 }
  0xa6   :  { %46 = vadd.xlane.f32.xlu1 %v45_v27  ;;  %65 = vadd.xlane.f32.xlu0 %v64_v24 }
  0xaa   :  { %68 = vadd.xlane.f32.xlu0 %v67_v28 }
 0x12f   :  { %v44_v30 = vpop.xlane.xlu0 %43 }
 0x130   :  { %141 = vlog2.f32 %v44_v30 }
 0x133   :  { %v47_v31 = vpop.xlane.xlu1 %46  ;;  %v66_v34 = vpop.xlane.xlu0 %65 }
 0x134   :  { %143 = vlog2.f32 %v47_v31 }
 0x137   :  { %v69_v41 = vpop.xlane.xlu0 %68 }
 0x13a   :  { %v142_v32 = vpop.eup %141 }
 0x13b   :  { %v49_v33 = vmul.f32 0.6931472, %v142_v32 }
 0x13d   :  { %v52_v35 = vadd.f32 %v49_v33, %v32_v11 }
 0x13e   :  { %v144_v36 = vpop.eup %143 }
 0x13f   :  { %v51_v37 = vmul.f32 0.6931472, %v144_v36  ;;  %v70_v38 = vsub.f32 %v52_v35, %v66_v34 }
 0x141   :  { %v77_v39 = vmul.f32 %v70_v38, %v14_v2  ;;  %v53_v40 = vadd.f32 %v51_v37, %v35_v14 }
 0x143   :  { %v71_v42 = vsub.f32 %v53_v40, %v69_v41  ;;  %81 = vperm.xlu0 %135, %v77_v39  }
 0x145   :  { %v78_v43 = vmul.f32 %v71_v42, %v15_v6 }
 0x147   :  { %96 = vperm.xlu0 %135, %v15_v6   ;;  %86 = vperm.xlu1 %136, %v78_v43  }
 0x14b   :  { %91 = vperm.xlu1 %136, %v14_v2  }
 0x1c2   :  { %v82_v44 = vpop.permute.xlu0 %81 }
 0x1c6   :  { %v87_v45 = vpop.permute.xlu1 %86  ;;  %v97_v46 = vpop.permute.xlu0 %96 }
 0x1c7   :  { %v100_v47 = vsel %vm76_vm3, %v87_v45, %v97_v46 }
 0x1c8   :  { %v103_v50 = vsel %vm101_vm4, %v100_v47, 0.0 }
 0x1ca   :  { %v92_v48 = vpop.permute.xlu1 %91 }
 0x1cb   :  { %v99_v49 = vsel %vm76_vm3, %v82_v44, %v92_v48 }
 0x1cc   :  { %v102_v51 = vsel %vm101_vm4, %v99_v49, 0.0 }
 0x1cd   :  { %v104_v52 = vadd.f32 %v103_v50, %v102_v51 }
 0x1cf   :  { %v105_v53 = vrot.slane %v104_v52, 4 }
 0x1d1   :  { %v106_v54 = vadd.f32 %v105_v53, %v104_v52 }
 0x1d3   :  { %v107_v55 = vrot.slane %v106_v54, 2 }
 0x1d5   :  { %v108_v56 = vadd.f32 %v107_v55, %v106_v54 }
 0x1d7   :  { %v109_v57 = vrot.slane %v108_v56, 1 }
 0x1d9   :  { %v110_v58 = vadd.f32 %v109_v57, %v108_v56 }
 0x1db   :  { %112 = vst.msk [vmem:[#allocation2] sm:$0x1] %vm111_vm5, %v110_v58 }
 0x1dc   :  { %156 = shalt.err (!%p153_p4)
}
 0x1dd   :  { %s157_s21 = scalar_lea.hbm %s219_s2, 16 }
 0x1de   :  { %p158_p5 = scmp.ne.s32.totalorder %s219_s2, %s157_s21  ;;  %p161_p6 = scmp.lt.u32.totalorder %s157_s21, %s219_s2 }
 0x1e0   :  { %p163_p7 = pnand %p161_p6, %p158_p5 }
 0x1e2   :  { %166 = shalt.err (!%p163_p7)
}
 0x1e3   :  { %122 = dma.vmem_to_hbm [thread:$0]  %s120_s1, 16, %s219_s2, [#allocation3]  }
 0x1e4   :  { %167 = dma.done.wait [#allocation3], 16  }
 0x1e5   :  { %168 = vsyncadd [#allocation3], 4294967280 }
 0x1e6   :  { %126 = vsyncpa [#allocation3], 1 }

</bundles_post_ra>
